<compile_context>
chip_gen: v7x
topology: tpu7x:2x2x1
jax: 0.10.0
libtpu: 0.0.40
codegen_flags: <defaults>
</compile_context>

<pallas_src>
import functools

import jax
import jax.numpy as jnp
import numpy as np
from jax.experimental import pallas as pl
from jax.experimental.pallas import tpu as pltpu


def _s4_kernel(xt_ref, wcomb_ref, bcomb_ref, o_ref, acc_ref, *, inv_l):
    """Grid = (B, num_L_tiles); L (reduction) axis last.

    xt_ref    : (1, d_in, tile_l)  -- sequence L sits on the lane axis
    wcomb_ref : (d_in, d_out)      -- Wenc @ Wdec, resident every step
    bcomb_ref : (1, d_out)         -- benc @ Wdec + bdec
    o_ref     : (1, 1, d_out)      -- written only on the last L step
    acc_ref   : (1, d_in) f32 VMEM scratch running sum over L
    """
    l = pl.program_id(1)

    @pl.when(l == 0)
    def _():
        acc_ref[...] = jnp.zeros_like(acc_ref)

    # Lane-dense partial sum over this L tile (cross-lane reduce on the XLU).
    acc_ref[...] += jnp.sum(xt_ref[...].astype(jnp.float32), axis=-1)

    @pl.when(l == pl.num_programs(1) - 1)
    def _():
        mean_bd = acc_ref[...] * inv_l                                # (1, d_in)
        out = jnp.dot(mean_bd, wcomb_ref[...],
                      preferred_element_type=jnp.float32) + bcomb_ref[...]
        o_ref[...] = out.reshape(o_ref.shape).astype(o_ref.dtype)


def s4model_forward(x, wenc, benc, wdec, bdec, *, tile_l=128):
    """x: (B, L, d_input) -> (B, d_output), identical to the executed PyTorch forward."""
    B, L, d_in = x.shape
    d_out = wdec.shape[1]

    # --- linear fusion (done once in the wrapper, tiny matrices) ---
    wcomb = jnp.dot(wenc, wdec)                       # (d_in, d_out)
    bcomb = jnp.dot(benc, wdec) + bdec                # (1, d_out)

    # --- lane-dense layout: put the long L axis on lanes ---
    xt = jnp.transpose(x, (0, 2, 1))                  # (B, d_in, L)

    tile_l = min(tile_l, L)
    assert L % tile_l == 0, "example keeps L a multiple of the L tile"
    num_l = L // tile_l

    kernel = functools.partial(_s4_kernel, inv_l=1.0 / L)

    # Advisory cost hint: the kernel is HBM-bound on streaming x.
    itemsize = x.dtype.itemsize
    flops = B * L * d_in + 2 * B * d_in * d_out
    bytes_accessed = (x.size * itemsize
                      + wcomb.size * wcomb.dtype.itemsize
                      + bcomb.size * bcomb.dtype.itemsize
                      + B * d_out * itemsize)

    out3 = pl.pallas_call(
        kernel,
        out_shape=jax.ShapeDtypeStruct((B, 1, d_out), x.dtype),
        grid_spec=pltpu.PrefetchScalarGridSpec(
            num_scalar_prefetch=0,
            grid=(B, num_l),                           # reduction axis last
            in_specs=[
                # x tile: (1, d_in, tile_l); last dim is 128-wide (lane-dense DMA)
                pl.BlockSpec((1, d_in, tile_l), lambda b, l: (b, 0, l)),
                # tiny combined weight / bias, same block every grid step
                pl.BlockSpec((d_in, d_out), lambda b, l: (0, 0)),
                pl.BlockSpec((1, d_out), lambda b, l: (0, 0)),
            ],
            out_specs=pl.BlockSpec((1, 1, d_out), lambda b, l: (b, 0, 0)),
            scratch_shapes=[pltpu.VMEM((1, d_in), jnp.float32)],
        ),
        compiler_params=pltpu.CompilerParams(
            # B axis parallel (v7x dual-TC), L axis is the accumulator reduction.
            dimension_semantics=("parallel", "arbitrary"),
            # Tiles here are tiny; this cap is safe on v5e/v6e/v7x alike.
            vmem_limit_bytes=32 * 1024 * 1024,
        ),
        cost_estimate=pl.CostEstimate(flops=flops, transcendentals=0,
                                      bytes_accessed=bytes_accessed),
    )(xt, wcomb, bcomb)

    # TODO(synk): d_out=4 (<128) means a masked store; pad d_out to 128 in the
    # out_spec if this ever runs at production output widths.
    return out3.reshape(B, d_out)


if __name__ == "__main__":
    # Small shapes consistent with the module's executed forward:
    # batch=2, seq_len=256 (2 lane-dense L tiles of 128), d_input=4,
    # d_model=32, d_output=4.
    B, L, D_IN, D_MODEL, D_OUT = 2, 256, 4, 32, 4

    key = jax.random.PRNGKey(0)
    kx, k1, k2, k3, k4 = jax.random.split(key, 5)

    x = jax.random.normal(kx, (B, L, D_IN), dtype=jnp.float32)

    # Deterministic parameter init (Linear-style scaling).
    wenc = jax.random.normal(k1, (D_IN, D_MODEL), dtype=jnp.float32) / np.sqrt(D_IN)
    benc = jax.random.normal(k2, (1, D_MODEL), dtype=jnp.float32) * 0.01
    wdec = jax.random.normal(k3, (D_MODEL, D_OUT), dtype=jnp.float32) / np.sqrt(D_MODEL)
    bdec = jax.random.normal(k4, (1, D_OUT), dtype=jnp.float32) * 0.01

    out = jax.block_until_ready(s4model_forward(x, wenc, benc, wdec, bdec))

    # Pure-JAX, UNFUSED reference of the exact executed PyTorch forward:
    # encoder -> mean over L -> decoder.
    ref = jnp.einsum('bld,dh->blh', x, wenc) + benc
    ref = jnp.mean(ref, axis=1)
    ref = ref @ wdec + bdec

    np.testing.assert_allclose(np.asarray(out), np.asarray(ref),
                               rtol=1e-4, atol=1e-5)
    print("KERNEL_OK")
</pallas_src>

<mosaic_0001>
module attributes {stable_mosaic.version = 11 : i64} {
  func.func @_s4_kernel(%arg0: i32, %arg1: i32, %arg2: memref<1x4x128xf32, #tpu.memory_space<vmem>>, %arg3: memref<4x4xf32, #tpu.memory_space<vmem>>, %arg4: memref<1x4xf32, #tpu.memory_space<vmem>>, %arg5: memref<1x1x4xf32, #tpu.memory_space<vmem>>, %arg6: memref<1x4xf32, #tpu.memory_space<vmem>>) attributes {dimension_semantics = [#tpu.dimension_semantics<parallel>, #tpu.dimension_semantics<arbitrary>], iteration_bounds = array<i64: 2, 2>, scalar_prefetch = 0 : i64, scratch_operands = 1 : i64, tpu.core_type = #tpu.core_type<tc>, window_params = [{transform_indices = @transform_0, window_bounds = array<i64: 1, 4, 128>}, {pipeline_mode = #tpu.pipeline_mode<synchronous>, transform_indices = @transform_1, window_bounds = array<i64: 4, 4>}, {pipeline_mode = #tpu.pipeline_mode<synchronous>, transform_indices = @transform_2, window_bounds = array<i64: 1, 4>}, {transform_indices = @transform_3, window_bounds = array<i64: 1, 1, 4>}]} {
    %c0_i32 = arith.constant 0 : i32
    %0 = arith.cmpi eq, %arg1, %c0_i32 : i32
    %1 = arith.extui %0 : i1 to i32
    %c0_i32_0 = arith.constant 0 : i32
    %2 = arith.cmpi ne, %1, %c0_i32_0 : i32
    scf.if %2 {
      %cst_8 = arith.constant 0.000000e+00 : f32
      %11 = vector.broadcast %cst_8 : f32 to vector<1x4xf32>
      %c0_9 = arith.constant 0 : index
      %c0_10 = arith.constant 0 : index
      %12 = vector.load %arg6[%c0_9, %c0_10] : memref<1x4xf32, #tpu.memory_space<vmem>>, vector<1x4xf32>
      tpu.vector_store %arg6[%c0_9, %c0_10], %11 {strides = array<i32>} : memref<1x4xf32, #tpu.memory_space<vmem>>, vector<1x4xf32>,
    } else {
    }
    %c0 = arith.constant 0 : index
    %c0_1 = arith.constant 0 : index
    %3 = vector.load %arg6[%c0, %c0_1] : memref<1x4xf32, #tpu.memory_space<vmem>>, vector<1x4xf32>
    %c0_2 = arith.constant 0 : index
    %c0_3 = arith.constant 0 : index
    %c0_4 = arith.constant 0 : index
    %4 = vector.load %arg2[%c0_2, %c0_3, %c0_4] : memref<1x4x128xf32, #tpu.memory_space<vmem>>, vector<1x4x128xf32>
    %cst = arith.constant dense<0.000000e+00> : vector<1x4xf32>
    %5 = vector.multi_reduction <add>, %4, %cst [2] : vector<1x4x128xf32> to vector<1x4xf32>
    %6 = arith.addf %3, %5 : vector<1x4xf32>
    %c0_5 = arith.constant 0 : index
    %c0_6 = arith.constant 0 : index
    %7 = vector.load %arg6[%c0_5, %c0_6] : memref<1x4xf32, #tpu.memory_space<vmem>>, vector<1x4xf32>
    tpu.vector_store %arg6[%c0_5, %c0_6], %6 {strides = array<i32>} : memref<1x4xf32, #tpu.memory_space<vmem>>, vector<1x4xf32>,
    %c1_i32 = arith.constant 1 : i32
    %8 = arith.cmpi eq, %arg1, %c1_i32 : i32
    %9 = arith.extui %8 : i1 to i32
    %c0_i32_7 = arith.constant 0 : i32
    %10 = arith.cmpi ne, %9, %c0_i32_7 : i32
    scf.if %10 {
      %c0_8 = arith.constant 0 : index
      %c0_9 = arith.constant 0 : index
      %11 = vector.load %arg6[%c0_8, %c0_9] : memref<1x4xf32, #tpu.memory_space<vmem>>, vector<1x4xf32>
      %cst_10 = arith.constant 3.906250e-03 : f32
      %12 = vector.broadcast %cst_10 : f32 to vector<1x4xf32>
      %13 = arith.mulf %11, %12 : vector<1x4xf32>
      %c0_11 = arith.constant 0 : index
      %c0_12 = arith.constant 0 : index
      %14 = vector.load %arg3[%c0_11, %c0_12] : memref<4x4xf32, #tpu.memory_space<vmem>>, vector<4x4xf32>
      %cst_13 = arith.constant dense<0.000000e+00> : vector<1x4xf32>
      %15 = tpu.matmul %13, %14, %cst_13 {dimension_numbers = #tpu.dot_dimension_numbers<[1], [0], [0], [1], [0, 0, 1, 1], [], []>} : vector<1x4xf32>, vector<4x4xf32>, vector<1x4xf32> -> vector<1x4xf32>
      %c0_14 = arith.constant 0 : index
      %c0_15 = arith.constant 0 : index
      %16 = vector.load %arg4[%c0_14, %c0_15] : memref<1x4xf32, #tpu.memory_space<vmem>>, vector<1x4xf32>
      %17 = arith.addf %15, %16 : vector<1x4xf32>
      %18 = vector.shape_cast %17 : vector<1x4xf32> to vector<1x1x4xf32>
      %c0_16 = arith.constant 0 : index
      %c0_17 = arith.constant 0 : index
      %c0_18 = arith.constant 0 : index
      %19 = vector.load %arg5[%c0_16, %c0_17, %c0_18] : memref<1x1x4xf32, #tpu.memory_space<vmem>>, vector<1x1x4xf32>
      tpu.vector_store %arg5[%c0_16, %c0_17, %c0_18], %18 {strides = array<i32>} : memref<1x1x4xf32, #tpu.memory_space<vmem>>, vector<1x1x4xf32>,
    } else {
    }
    return
  }
  func.func @transform_0(%arg0: i32, %arg1: i32) -> (i32, i32, i32) {
    %c0_i32 = arith.constant 0 : i32
    %c0_i32_0 = arith.constant 0 : i32
    return %arg0, %c0_i32, %arg1 : i32, i32, i32
  }
  func.func @transform_1(%arg0: i32, %arg1: i32) -> (i32, i32) {
    %c0_i32 = arith.constant 0 : i32
    %c0_i32_0 = arith.constant 0 : i32
    %c0_i32_1 = arith.constant 0 : i32
    return %c0_i32, %c0_i32_0 : i32, i32
  }
  func.func @transform_2(%arg0: i32, %arg1: i32) -> (i32, i32) {
    %c0_i32 = arith.constant 0 : i32
    %c0_i32_0 = arith.constant 0 : i32
    %c0_i32_1 = arith.constant 0 : i32
    return %c0_i32, %c0_i32_0 : i32, i32
  }
  func.func @transform_3(%arg0: i32, %arg1: i32) -> (i32, i32, i32) {
    %c0_i32 = arith.constant 0 : i32
    %c0_i32_0 = arith.constant 0 : i32
    %c0_i32_1 = arith.constant 0 : i32
    return %arg0, %c0_i32, %c0_i32_0 : i32, i32, i32
  }
}

</mosaic_0001>

<bundles_post_ra>
// kernel: tpu_custom_call.1
= control target key start
LH: loop header
LB: loop body
LE: loop exit
PB: predicated region body
PF: predicated region fallthrough
CT: control target
= control target key end

     0   :  { %s1109_s0 = inlined_call_operand.hbm [shape: f32[2,4,256], index: 0, kind: input, shape index: {}]   ;;  %s1110_s1 = inlined_call_operand.hbm [shape: f32[4,4], index: 1, kind: input, shape index: {}]   ;;  %s1111_s2 = inlined_call_operand.vmem [shape: f32[1,4], index: 2, kind: input, shape index: {}]   ;;  %s1112_s3 = inlined_call_operand.hbm [shape: f32[2,1,4], index: 3, kind: output, shape index: {}]  }
   0x1   :  { %1124 = sst [smem:[#allocation17_spill]] %s1110_s1 }
   0x2   :  { %1125 = sst [smem:[#allocation18_spill]] %s1111_s2 }
   0x3   :  { %1126 = sst [smem:[#allocation19_spill]] %s1112_s3 }
   0x4   :  { %8 = vsyncpa [#allocation4], 0 }
   0x5   :  { %10 = vsyncpa [#allocation4 + $0x1], 0 }
   0x6   :  { %11 = vsyncpa [#allocation7], 0 }
   0x7   :  { %12 = vsyncpa [#allocation5], 0 }
   0x8   :  { %14 = vsyncpa [#allocation5 + $0x1], 0  ;;  %s840_s12 = smov 0   ;;  %s842_s13 = smov 0  }
   0x9   :  { %s844_s14 = smov 0   ;;  %s846_s15 = smov 0  }
   0xa   :  { %s848_s16 = smov 0   ;;  %s850_s17 = smov 0  }
   0xb   :  { %s852_s18 = smov 0   ;;  %s854_s19 = smov 0  }
   0xc   :  { %s856_s20 = smov 0   ;;  %s858_s21 = smov 0  }
   0xd   :  { %s860_s22 = smov 0  }
   0xe LB: > { %1127 = sst [smem:[#allocation12_spill]] %s770_s12  ;;  %s482_s23 = sadd.s32 4294967295, %s810_s22   ;;  %s810_s22 = sphi %s860_s22, %s20_s22   ;;  %s806_s21 = sphi %s858_s21, %s1162_s21   ;;  %s802_s20 = sphi %s856_s20, %s1161_s20   ;;  %s798_s19 = sphi %s854_s19, %s1160_s19   ;;  %s794_s18 = sphi %s852_s18, %s1159_s18   ;;  %s790_s17 = sphi %s850_s17, %s1158_s17   ;;  %s786_s16 = sphi %s848_s16, %s1157_s16   ;;  %s782_s15 = sphi %s846_s15, %s1156_s15   ;;  %s778_s14 = sphi %s844_s14, %s1155_s14   ;;  %s774_s13 = sphi %s842_s13, %s1154_s13   ;;  %s770_s12 = sphi %s840_s12, %s1153_s12  }
   0xf   : > { %1128 = sst [smem:[#allocation13_spill]] %s798_s19  ;;  %s483_s24 = sadd.s32 4294967294, %s810_s22  }
  0x10   : > { %p54_p0 = scmp.ne.s32.totalorder %s786_s16, %s782_s15  ;;  %p896_p1 = scmp.eq.s32.totalorder %s482_s23, 0 }
  0x11   : > { %s109_s26 = sadd.s32 1, %s778_s14  ;;  %p119_p2 = scmp.ne.s32.totalorder %s778_s14, %s774_s13 }
  0x12   : > { %s1129_s25 = scalar_select %p896_p1, 1, 0 }
  0x13   : > { %p905_p3 = por %p896_p1, %p54_p0  ;;  %p120_p4 = scmp.eq.s32.totalorder %s482_s23, 3 }
  0x14   : > { %p125_p5 = scmp.ne.s32.totalorder %s774_s13, %s770_s12  ;;  %p126_p6 = scmp.eq.s32.totalorder %s483_s24, 3 }
  0x15   : > { %s1130_s27 = scalar_select %p905_p3, 1, 0 }
  0x16   : > { %p911_p7 = por %p120_p4, %p119_p2  ;;  %p484_p8 = scmp.ge.s32.totalorder %s810_s22, 1 }
  0x17   : > { %p916_p9 = por %p126_p6, %p125_p5  ;;  %p133_p10 = scmp.lt.s32.totalorder %s810_s22, 5 }
  0x18   : > { %s1131_s28 = scalar_select %p911_p7, 1, 0 }
  0x19   : > { %s1133_s29 = scalar_select %p916_p9, 1, 0 }
  0x1a   : > { %1132 = sst [smem:[#allocation14_spill]] %s1131_s28  ;;  %p921_p11 = pnand %p484_p8, %p133_p10 }
  0x1b   : > { %1134 = sst [smem:[#allocation15_spill]] %s1133_s29  ;;  %s812_s4 = smov [#allocation6]  }
  0x1c   : > { %s1135_s30 = scalar_select %p921_p11, 1, 0 }
  0x1d   : > { %s146_s5 = sshll.u32 %s812_s4, 4  ;;  %p515_p12 = pneg %p921_p11  ;;  %s147_s5 = int_to_ptr.vmem [resolvable:$true] %s146_s5 }
  0x1e   : > { %s29_s7 = sadd.s32 1, %s802_s20  ;;  %s1137_s1 = sld [smem:[#allocation17_spill]] }
  0x1f   : > { %p929_p13 = pnand %p515_p12, %p896_p1 }
  0x21   : > { %p628_p2 = pneg %p929_p13 }
  0x24   : > { %s626_s10 = scalar_lea.hbm %s1137_s1, 64 }
  0x25   : > { %p627_p0 = scmp.ne.s32.totalorder %s1137_s1, %s626_s10  ;;  %p633_p6 = scmp.lt.u32.totalorder %s626_s10, %s1137_s1 }
  0x27   : > { %p629_p4 = pnand %p628_p2, %p627_p0 }
  0x29   : > { %p630_p5 = pneg %p629_p4 }
  0x2b   : > { %p635_p8 = pnand %p633_p6, %p630_p5 }
  0x2d   : > { %638 = shalt.err (!%p635_p8)
}
  0x2e   : > { %s639_s4 = scalar_lea.vmem %s147_s5, 64  ;;  %p647_p7 = scmp.lt.s32.totalorder %s147_s5, %s147_s5 }
  0x2f   : > { %p640_p10 = scmp.ne.s32.totalorder %s147_s5, %s639_s4  ;;  %p648_p1 = scmp.lt.s32.totalorder %s639_s4, %s639_s4 }
  0x31   : > { %p642_p12 = pnand %p640_p10, %p628_p2  ;;  %p649_p3 = por %p648_p1, %p647_p7 }
  0x33   : > { %p643_p9 = pneg %p642_p12 }
  0x35   : > { %p650_p11 = pnand %p649_p3, %p643_p9 }
  0x37   : > { %653 = shalt.err (!%p650_p11)
}
  0x38   : > { %518 = dma.hbm_to_vmem [thread:$0]  (!%p929_p13), %s1137_s1, 64, %s147_s5, [#allocation7]  }
  0x39   : > { %p30_p0 = scmp.ge.s32.totalorder %s29_s7, 2  ;;  %s32_s10 = sadd.s32 1, %s806_s21 }
  0x3a   : > { %s41_s11 = sadd.s32 1, %s790_s17  ;;  %p48_p1 = scmp.ne.s32.totalorder %s790_s17, %s786_s16 }
  0x3b   : > { %s1164_s7 = smov (%p30_p0, %s29_s7), 0  ;;  %s1166_s10 = smov (!%p30_p0, %s32_s10), %s806_s21 }
  0x3c   : > { %1138 = sst [smem:[#allocation16_spill]] %s1164_s7  ;;  %s37_s6 = ssub.s32 %s802_s20, %s1164_s7 }
  0x3d   : > { %p49_p3 = scmp.eq.s32.totalorder %s810_s22, 0  ;;  %p34_p7 = scmp.ge.s32.totalorder %s1166_s10, 2 }
  0x3e   : > { %p528_p9 = scmp.lt.s32.totalorder %s810_s22, 4  ;;  %s160_s5 = sand.u32 1, %s790_s17  }
  0x3f   : > { %p961_p11 = por %p49_p3, %p48_p1  ;;  %s1168_s10 = smov (%p34_p7, %s1166_s10), 0 }
  0x40   : > { %s487_s23 = sshll.u32 %s160_s5, 2  ;;  %s36_s24 = ssub.s32 %s806_s21, %s1168_s10 }
  0x41   : > { %s38_s4 = sor.u32 %s37_s6, %s36_s24  ;;  %p107_p13 = scmp.eq.s32.totalorder %s36_s24, 0 }
  0x42   : > { %p39_p2 = scmp.eq.s32.totalorder %s38_s4, 0  ;;  %s488_s8 = sshll.u32 %s806_s21, 1 }
  0x43   : > { %s974_s9 = scalar_select %p107_p13, %s778_s14, %s109_s26  }
  0x44   : > { %s977_s1 = scalar_select %p39_p2, %s790_s17, %s41_s11  }
  0x45   : > { %s169_s7 = sadd.s32 %s802_s20, %s488_s8  ;;  %s164_s29 = scalar_lea.vmem [#allocation3], %s487_s23 }
  0x46   : > { %s173_s12 = sshll.u32 %s164_s29, 4  ;;  %s489_s3 = sshll.u32 %s169_s7, 6  ;;  %s980_s12 = int_to_ptr.vmem [resolvable:$true] %s173_s12 }
  0x47   : > { %s985_s2 = scalar_lea.hbm %s1109_s0, %s489_s3  ;;  %p991_p4 = pnand %p528_p9, %p961_p11 }
  0x48   : > { %s161_s29 = scalar_lea.sflag [#allocation4], %s160_s5  ;;  %s654_s7 = scalar_lea.hbm %s985_s2, 64 }
  0x49   : > { %p655_p5 = scmp.ne.s32.totalorder %s985_s2, %s654_s7  ;;  %p656_p6 = pneg %p991_p4 }
  0x4a   : > { %s659_s28 = scalar_lea.hbm %s1109_s0, 256  ;;  %p660_p12 = scmp.lt.u32.totalorder %s985_s2, %s1109_s0 }
  0x4b   : > { %p657_p8 = pnand %p656_p6, %p655_p5  ;;  %p661_p0 = scmp.lt.u32.totalorder %s659_s28, %s654_s7 }
  0x4c   : > { %p663_p3 = scmp.lt.u32.totalorder %s654_s7, %s985_s2 }
  0x4d   : > { %p658_p10 = pneg %p657_p8  ;;  %p662_p1 = por %p661_p0, %p660_p12 }
  0x4f   : > { %p664_p7 = por %p663_p3, %p662_p1 }
  0x51   : > { %p665_p9 = pnand %p664_p7, %p658_p10 }
  0x53   : > { %668 = shalt.err (!%p665_p9)
}
  0x54   : > { %s669_s15 = scalar_lea.vmem %s980_s12, 64  ;;  %s813_s5 = smov [#allocation3]  }
  0x55   : > { %p670_p11 = scmp.ne.s32.totalorder %s980_s12, %s669_s15  ;;  %s674_s23 = sshll.u32 %s813_s5, 4  ;;  %s675_s23 = int_to_ptr.vmem [resolvable:$false] %s674_s23 }
  0x56   : > { %s676_s24 = scalar_lea.vmem %s675_s23, 128  ;;  %p677_p5 = scmp.lt.s32.totalorder %s980_s12, %s675_s23 }
  0x57   : > { %p672_p13 = pnand %p670_p11, %p656_p6  ;;  %p678_p8 = scmp.lt.s32.totalorder %s676_s24, %s669_s15 }
  0x59   : > { %p673_p2 = pneg %p672_p13  ;;  %p679_p12 = por %p678_p8, %p677_p5 }
  0x5b   : > { %p680_p0 = pnand %p679_p12, %p673_p2 }
  0x5d   : > { %683 = shalt.err (!%p680_p0)
}
  0x5e   : > { %522 = dma.hbm_to_vmem [thread:$0]  (!%p991_p4), %s985_s2, 64, %s980_s12, %s161_s29  }
  0x5f   : > { %p1141_p10 = scmp.ne.s32.totalorder %s1135_s30, 0 }
  0x60   : > { %s184_s4 = sand.u32 (!%p1141_p10), 1, %s786_s16   ;;  %p1142_p6 = scmp.ne.s32.totalorder (!%p1141_p10), %s1130_s27, 0 }
  0x61   : > { %182 = sbr.rel (%p1141_p10) target bundleno = 659 (0x293), region = 32  ;;  %s491_s8 = sshll.u32 (!%p1141_p10), %s184_s4, 2 }
  0x62   : > { %s185_s7 = scalar_lea.sflag (!%p1141_p10), [#allocation4], %s184_s4  ;;  %s188_s3 = scalar_lea.vmem (!%p1141_p10), [#allocation3], %s491_s8 }
  0x68   : > { %757 = dma.done.wait (%p1142_p6), %s185_s7, 64  }
  0x69   : > { %759 = vsyncadd (%p1142_p6), %s185_s7, 4294967232  ;;  %p1143_p1 = scmp.ne.s32.totalorder %s1129_s25, 0 }
  0x6b   : > { %761 = dma.done.wait (%p1143_p1), [#allocation7], 64  }
  0x6c   : > { %763 = vsyncadd (%p1143_p1), [#allocation7], 4294967232  ;;  %s212_s2 = sand.u32 1, %s774_s13   ;;  %p493_p4 = scmp.ne.s32.totalorder %s794_s18, 0 }
  0x6d   : > { %s1034_s12 = scalar_lea.vmem [#allocation8], %s212_s2  ;;  %vm218_vm0 = vcmask (!%p493_p4), 24576   ;;  %v814_v0 = vmov (!%p493_p4), 0.0  }
  0x6e   : > { %217 = sbr.rel (%p493_p4) target bundleno = 117 (0x75), region = 44  ;;  %219 = vst.msk [vmem:[#allocation2] sm:$0x1] (!%p493_p4), %vm218_vm0, %v814_v0 }
  0x75 PF: > { %v221_v1 = vld [vmem:[%s188_s3] sm:$0xf]  ;;  %vm222_vm1 = vcmask 1043456   ;;  %v815_v3 = vmov 0   ;;  %v227_v4 = vlaneseq  ;;  %v816_v8 = vmov 1966171168  }
  0x76   : > { %v223_v2 = vsel %vm222_vm1, %v221_v1, 0.0  ;;  %625 = vset.pattern.permute.xlu0 %v815_v3  ;;  %v246_v9 = vunpack.c.l.s4 %v816_v8  ;;  %v220_v30 = vld [vmem:[#allocation2] sm:$0x1]  ;;  %vm292_vm2 = vcmask 24576   ;;  %p494_p3 = scmp.ne.s32.totalorder %s794_s18, 1 }
  0x77   : > { %224 = vadd.xlane.f32.xlu0 %v223_v2  ;;  %v228_v5 = vshrl.u32 %v227_v4, 7  ;;  %v271_v6 = vand.u32 127, %v227_v4  ;;  %v300_v33 = vld [vmem:[#allocation6] sm:$0xf] (!%p494_p3)  ;;  %v817_v35 = vmov (!%p494_p3), 0.0   ;;  %vm818_vm3 = vmmov (!%p494_p3), 0  }
  0x78   : > { %v247_v10 = vunpack.c.0.s8 %v246_v9  ;;  %502 = vmatprep.subr.mxu0 (!%p494_p3), %v817_v35  ;;  %504 = vmatprep.mubr.msk.f32.mxu0 (!%p494_p3), %vm818_vm3, %v817_v35  ;;  %vm302_vm4 = vcmask (!%p494_p3), 31744   ;;  %s1144_s30 = sld [smem:[#allocation18_spill]] (!%p494_p3) }
  0x79   : > { %v274_v7 = vsub.s32 %v271_v6, %v228_v5  ;;  %v229_v11 = vsub.s32 0, %v228_v5  ;;  %v233_v12 = vsub.s32 1, %v228_v5  ;;  %v237_v13 = vsub.s32 2, %v228_v5  ;;  %503 = vmatpush3.msk.msra.mxu0 (!%p494_p3), %vm222_vm1, %v300_v33 }
  0x7a   : > { %v241_v14 = vsub.s32 3, %v228_v5  ;;  %v250_v16 = vsub.s32 %v247_v10, %v228_v5 }
  0x7e   : > { %v301_v37 = vld [vmem:[%s1144_s30] sm:$0x1] (!%p494_p3) }
 0x104   : > { %v225_v15 = vpop.xlane.xlu0 %224 }
 0x105   : > { %v230_v17 = vrot.slane %v225_v15, %v229_v11  ;;  %v234_v18 = vrot.slane %v225_v15, %v233_v12  ;;  %v238_v19 = vrot.slane %v225_v15, %v237_v13  ;;  %v242_v20 = vrot.slane %v225_v15, %v241_v14 }
 0x107   : > { %v243_v21 = vcombine.low %v230_v17, %v234_v18  ;;  %v244_v22 = vcombine.low %v238_v19, %v242_v20 }
 0x109   : > { %v251_v23 = vrot.slane %v243_v21, %v250_v16  ;;  %v258_v24 = vrot.slane %v244_v22, %v250_v16 }
 0x10b   : > { %v259_v25 = vcombine.low %v251_v23, %v258_v24 }
 0x10d   : > { %v266_v26 = vrot.slane %v259_v25, %v250_v16 }
 0x10f   : > { %268 = vperm.xlu0 %625, %v266_v26  }
 0x18e   : > { %v269_v27 = vpop.permute.xlu0 %268 }
 0x18f   : > { %v275_v28 = vrot.slane %v269_v27, %v274_v7 }
 0x191   : > { %v282_v29 = vrot.slane %v275_v28, %v250_v16  ;;  %297 = sbr.rel (%p494_p3) target bundleno = 632 (0x278), region = 48 }
 0x193   : > { %v289_v31 = vrot.slane %v282_v29, %v250_v16 }
 0x195   : > { %v291_v32 = vadd.f32 %v289_v31, %v220_v30 }
 0x197   : > { %293 = vst.msk [vmem:[#allocation2] sm:$0x1] %vm292_vm2, %v291_v32 }
 0x19e   : > { %v298_v34 = vld [vmem:[#allocation2] sm:$0x1] }
 0x19f   : > { %v299_v36 = vmul.f32 0.00390625, %v298_v34 }
 0x1a1   : > { %505 = vmatmul.mubr.msk.f32.vlgmr.msra.gmra.mrb[0].mxu0 %vm302_vm4, %v299_v36 }
 0x274   : > { %v375_v38 = vpop.f32.mrb[0].mxu0 }
 0x275   : > { %v376_v39 = vadd.f32 %v375_v38, %v301_v37  ;;  %v506_v40 = vpop.f32.mrb[1].mxu0 }
 0x277   : > { %379 = vst.msk [vmem:[%s1034_s12] sm:$0x1] %vm292_vm2, %v376_v39 }
 0x278 PF: > { %s1145_s18 = sld [smem:[#allocation13_spill]]  ;;  %s1146_s26 = sld [smem:[#allocation14_spill]] }
 0x279   : > { %s1147_s11 = sld [smem:[#allocation19_spill]]  ;;  %s393_s15 = sshll.u32 %s1034_s12, 4  ;;  %s394_s15 = int_to_ptr.vmem [resolvable:$true] %s393_s15 }
 0x27a   : > { %s381_s5 = scalar_lea.sflag [#allocation5], %s212_s2  ;;  %s684_s23 = scalar_lea.vmem %s394_s15, 16 }
 0x27b   : > { %p685_p7 = scmp.ne.s32.totalorder %s394_s15, %s684_s23  ;;  %s819_s24 = smov [#allocation8]  }
 0x27c   : > { %s688_s4 = sshll.u32 %s819_s24, 4  ;;  %s689_s4 = int_to_ptr.vmem [resolvable:$false] %s688_s4 }
 0x27d   : > { %s690_s8 = scalar_lea.vmem %s689_s4, 32  ;;  %p691_p2 = scmp.lt.s32.totalorder %s394_s15, %s689_s4 }
 0x27e   : > { %s497_s29 = sshll.u32 %s1145_s18, 4  ;;  %p1148_p9 = scmp.ne.s32.totalorder %s1146_s26, 0 }
 0x27f   : > { %s1050_s6 = scalar_lea.hbm %s1147_s11, %s497_s29  ;;  %p692_p5 = scmp.lt.s32.totalorder %s690_s8, %s684_s23 }
 0x280   : > { %p686_p11 = pnand %p685_p7, %p1148_p9 }
 0x281   : > { %p693_p8 = por %p692_p5, %p691_p2 }
 0x282   : > { %p687_p13 = pneg %p686_p11 }
 0x284   : > { %p694_p12 = pnand %p693_p8, %p687_p13 }
 0x286   : > { %697 = shalt.err (!%p694_p12)
}
 0x287   : > { %s698_s7 = scalar_lea.hbm %s1050_s6, 16  ;;  %s702_s12 = scalar_lea.hbm %s1147_s11, 32 }
 0x288   : > { %p699_p0 = scmp.ne.s32.totalorder %s1050_s6, %s698_s7  ;;  %p703_p1 = scmp.lt.u32.totalorder %s1050_s6, %s1147_s11 }
 0x289   : > { %p704_p4 = scmp.lt.u32.totalorder %s702_s12, %s698_s7  ;;  %p706_p7 = scmp.lt.u32.totalorder %s698_s7, %s1050_s6 }
 0x28a   : > { %p700_p10 = pnand %p699_p0, %p1148_p9 }
 0x28b   : > { %p705_p3 = por %p704_p4, %p703_p1 }
 0x28c   : > { %p701_p6 = pneg %p700_p10 }
 0x28d   : > { %p707_p11 = por %p706_p7, %p705_p3 }
 0x28f   : > { %p708_p13 = pnand %p707_p11, %p701_p6 }
 0x291   : > { %711 = shalt.err (!%p708_p13)
}
 0x292   : > { %513 = dma.vmem_to_hbm [thread:$0]  (%p1148_p9), %s394_s15, 16, %s1050_s6, %s381_s5  }
 0x293 PF: > { %s1149_s30 = sld [smem:[#allocation12_spill]]  ;;  %s1150_s18 = sld [smem:[#allocation15_spill]] }
 0x294   : > { %p530_p2 = scmp.ge.s32.totalorder %s810_s22, 2 }
 0x299   : > { %s405_s29 = sand.u32 1, %s1149_s30   ;;  %p1151_p5 = scmp.ne.s32.totalorder %s1150_s18, 0 }
 0x29a   : > { %s406_s19 = scalar_lea.sflag [#allocation5], %s405_s29 }
 0x29b   : > { %p524_p8 = pnand %p530_p2, %p1151_p5 }
 0x29d   : > { %765 = dma.done.wait (!%p524_p8), %s406_s19, 16  }
 0x29e   : > { %767 = vsyncadd (!%p524_p8), %s406_s19, 4294967280  ;;  %s20_s22 = sadd.s32 1, %s810_s22   ;;  %s1152_s26 = sld [smem:[#allocation16_spill]] }
 0x29f   : > { %p17_p12 = scmp.ge.s32.totalorder %s20_s22, 6   ;;  %s1153_s12 = smov %s774_s13 }
 0x2a0   : > { %s1154_s13 = smov %s778_s14  ;;  %s1155_s14 = smov %s974_s9 }
 0x2a1   : > { %s1156_s15 = smov %s786_s16  ;;  %s1157_s16 = smov %s790_s17 }
 0x2a2   : > { %s1158_s17 = smov %s977_s1  ;;  %s1159_s18 = smov %s802_s20 }
 0x2a3   : > { %s1160_s19 = smov %s806_s21  ;;  %s1162_s21 = smov %s1168_s10 }
 0x2a4   : > { %s1161_s20 = smov %s1152_s26  ;;  %19 = sbr.rel (!%p17_p12) target bundleno = 14 (0xe), region = 89 }
 0x2ab   :  { %410 = vsyncpa [#allocation4], 1 }
 0x2ac   :  { %412 = vsyncpa [#allocation4 + $0x1], 1 }
 0x2ad   :  { %413 = vsyncpa [#allocation7], 1 }
 0x2ae   :  { %414 = vsyncpa [#allocation5], 1 }
 0x2af   :  { %416 = vsyncpa [#allocation5 + $0x1], 1 }

</bundles_post_ra>
